<compile_context>
chip_gen: v7x
topology: tpu7x:2x2x1
jax: 0.10.0
libtpu: 0.0.40
codegen_flags: <defaults>
</compile_context>

<pallas_src>
import functools

import jax
import jax.numpy as jnp
from jax.experimental import pallas as pl
from jax.experimental.pallas import tpu as pltpu


def _round_up(x, m):
    return (x + m - 1) // m * m


def _head_kernel(x_ref, w1_ref, b1_ref, w2_ref, b2_ref, o_ref):
    # x/w1/w2 arrive as bf16 (wrapper casts); accumulate in f32 on the MXU.
    h = jnp.dot(x_ref[...], w1_ref[...], preferred_element_type=jnp.float32)
    # Bias + ReLU in f32 on the VPU.
    h = jnp.maximum(h + b1_ref[...], 0.0)
    # Second linear, again bf16 operands with f32 accumulation.
    y = jnp.dot(h.astype(w2_ref.dtype), w2_ref[...],
                preferred_element_type=jnp.float32)
    o_ref[...] = (y + b2_ref[...]).astype(o_ref.dtype)


@functools.partial(jax.jit, static_argnames=("block_m",))
def prediction_head(x, w1, b1, w2, b2, *, block_m=256):
    """Fused Linear -> ReLU -> Linear.

    x : [B, d_in]                (matmuls run in bf16, f32 accumulation)
    w1: [d_in, d_hid]  b1: [1, d_hid]
    w2: [d_hid, d_out] b2: [1, d_out]
    returns [B, d_out] in x.dtype
    """
    B, d_in = x.shape
    d_hid = w1.shape[1]
    d_out = w2.shape[1]
    out_dtype = x.dtype

    # MXU-friendly batch tile; pad B to a tile multiple instead of asserting.
    tm = _round_up(min(block_m, _round_up(B, 8)), 8)
    B_pad = _round_up(B, tm)

    # Lane-dense padding of hidden / output widths (multiples of 128).
    d_hid_p = _round_up(d_hid, 128)
    d_out_p = _round_up(d_out, 128)

    # bf16 matmul operands (halves HBM/VMEM traffic, fast MXU path); zero
    # padding is exact: padded hidden units see ReLU(0)=0 and padded w2 rows
    # are zero, padded output columns are sliced away below.
    xp = jnp.pad(x, ((0, B_pad - B), (0, 0))).astype(jnp.bfloat16)
    w1p = jnp.pad(w1, ((0, 0), (0, d_hid_p - d_hid))).astype(jnp.bfloat16)
    b1p = jnp.pad(b1.astype(jnp.float32), ((0, 0), (0, d_hid_p - d_hid)))
    w2p = jnp.pad(w2, ((0, d_hid_p - d_hid), (0, d_out_p - d_out))).astype(jnp.bfloat16)
    b2p = jnp.pad(b2.astype(jnp.float32), ((0, 0), (0, d_out_p - d_out)))

    grid = (B_pad // tm,)  # single "parallel" axis (megacore-shardable on v7x)

    out_itemsize = jnp.dtype(out_dtype).itemsize
    cost = pl.CostEstimate(
        flops=2 * B_pad * d_in * d_hid_p + 2 * B_pad * d_hid_p * d_out_p,
        transcendentals=0,
        bytes_accessed=(xp.size * 2 + w1p.size * 2 + w2p.size * 2
                        + b1p.size * 4 + b2p.size * 4
                        + B_pad * d_out_p * out_itemsize),
    )

    out_padded = pl.pallas_call(
        _head_kernel,
        out_shape=jax.ShapeDtypeStruct((B_pad, d_out_p), out_dtype),
        grid_spec=pltpu.PrefetchScalarGridSpec(
            num_scalar_prefetch=0,
            grid=grid,
            in_specs=[
                # x: tile over batch rows, full (true) feature dim.
                pl.BlockSpec((tm, d_in), lambda i: (i, 0)),
                # Weights / biases: constant block index -> resident in VMEM
                # across the whole grid.
                pl.BlockSpec((d_in, d_hid_p), lambda i: (0, 0)),
                pl.BlockSpec((1, d_hid_p), lambda i: (0, 0)),
                pl.BlockSpec((d_hid_p, d_out_p), lambda i: (0, 0)),
                pl.BlockSpec((1, d_out_p), lambda i: (0, 0)),
            ],
            out_specs=pl.BlockSpec((tm, d_out_p), lambda i: (i, 0)),
        ),
        compiler_params=pltpu.CompilerParams(
            dimension_semantics=("parallel",),
            vmem_limit_bytes=64 * 1024 * 1024,
        ),
        cost_estimate=cost,
    )(xp, w1p, b1p, w2p, b2p)

    # Strip batch + lane padding.
    return out_padded[:B, :d_out]


def init_params(key, dim_input, dim_output, dtype=jnp.float32):
    """Matches PredictionHead.init_weights(): trunc_normal(std=0.02) weights,
    zero biases."""
    dim_hidden = dim_input // 2
    k1, k2 = jax.random.split(key)
    w1 = 0.02 * jax.random.truncated_normal(k1, -2.0, 2.0, (dim_input, dim_hidden))
    w2 = 0.02 * jax.random.truncated_normal(k2, -2.0, 2.0, (dim_hidden, dim_output))
    b1 = jnp.zeros((1, dim_hidden), dtype)
    b2 = jnp.zeros((1, dim_output), dtype)
    return w1.astype(dtype), b1, w2.astype(dtype), b2


if __name__ == "__main__":
    key = jax.random.PRNGKey(0)
    kx, kp = jax.random.split(key)

    batch = 16
    dim_input = 32
    dim_output = 8

    x = jax.random.normal(kx, (batch, dim_input), dtype=jnp.float32)
    w1, b1, w2, b2 = init_params(kp, dim_input, dim_output)

    out = prediction_head(x, w1, b1, w2, b2)
    out = jax.block_until_ready(out)
    assert out.shape == (batch, dim_output)

    # Reference with the kernel's exact recipe (bf16 matmuls, f32 accumulation).
    xb = x.astype(jnp.bfloat16)
    h_ref = jnp.maximum(
        jnp.dot(xb, w1.astype(jnp.bfloat16), preferred_element_type=jnp.float32) + b1,
        0.0)
    ref_bf16 = jnp.dot(h_ref.astype(jnp.bfloat16), w2.astype(jnp.bfloat16),
                       preferred_element_type=jnp.float32) + b2
    assert jnp.allclose(out, ref_bf16, atol=1e-4, rtol=1e-4), "mismatch vs bf16 reference"

    # Loose check against the pure-f32 PyTorch-equivalent reference
    # (small expected divergence from bf16 matmul operands).
    ref_f32 = jnp.maximum(x @ w1 + b1, 0.0) @ w2 + b2
    assert jnp.allclose(out, ref_f32, atol=5e-3, rtol=5e-2), "mismatch vs f32 reference"

    print("KERNEL_OK")
</pallas_src>

<mosaic_0001>
module attributes {stable_mosaic.version = 11 : i64} {
  func.func @_head_kernel(%arg0: i32, %arg1: memref<16x32xbf16, #tpu.memory_space<vmem>>, %arg2: memref<32x128xbf16, #tpu.memory_space<vmem>>, %arg3: memref<1x128xf32, #tpu.memory_space<vmem>>, %arg4: memref<128x128xbf16, #tpu.memory_space<vmem>>, %arg5: memref<1x128xf32, #tpu.memory_space<vmem>>, %arg6: memref<16x128xf32, #tpu.memory_space<vmem>>) attributes {dimension_semantics = [#tpu.dimension_semantics<parallel>], iteration_bounds = array<i64: 1>, scalar_prefetch = 0 : i64, scratch_operands = 0 : i64, tpu.core_type = #tpu.core_type<tc>, window_params = [{transform_indices = @transform_0, window_bounds = array<i64: 16, 32>}, {pipeline_mode = #tpu.pipeline_mode<synchronous>, transform_indices = @transform_1, window_bounds = array<i64: 32, 128>}, {pipeline_mode = #tpu.pipeline_mode<synchronous>, transform_indices = @transform_2, window_bounds = array<i64: 1, 128>}, {pipeline_mode = #tpu.pipeline_mode<synchronous>, transform_indices = @transform_3, window_bounds = array<i64: 128, 128>}, {pipeline_mode = #tpu.pipeline_mode<synchronous>, transform_indices = @transform_4, window_bounds = array<i64: 1, 128>}, {transform_indices = @transform_5, window_bounds = array<i64: 16, 128>}]} {
    %c0 = arith.constant 0 : index
    %c0_0 = arith.constant 0 : index
    %0 = vector.load %arg1[%c0, %c0_0] : memref<16x32xbf16, #tpu.memory_space<vmem>>, vector<16x32xbf16>
    %c0_1 = arith.constant 0 : index
    %c0_2 = arith.constant 0 : index
    %1 = vector.load %arg2[%c0_1, %c0_2] : memref<32x128xbf16, #tpu.memory_space<vmem>>, vector<32x128xbf16>
    %cst = arith.constant dense<0.000000e+00> : vector<16x128xf32>
    %2 = tpu.matmul %0, %1, %cst {dimension_numbers = #tpu.dot_dimension_numbers<[1], [0], [0], [1], [0, 0, 1, 1], [], []>} : vector<16x32xbf16>, vector<32x128xbf16>, vector<16x128xf32> -> vector<16x128xf32>
    %c0_3 = arith.constant 0 : index
    %c0_4 = arith.constant 0 : index
    %3 = vector.load %arg3[%c0_3, %c0_4] : memref<1x128xf32, #tpu.memory_space<vmem>>, vector<1x128xf32>
    %4 = vector.broadcast %3 : vector<1x128xf32> to vector<16x128xf32>
    %5 = arith.addf %2, %4 : vector<16x128xf32>
    %cst_5 = arith.constant 0.000000e+00 : f32
    %6 = vector.broadcast %cst_5 : f32 to vector<16x128xf32>
    %7 = arith.maximumf %5, %6 : vector<16x128xf32>
    %8 = arith.truncf %7 : vector<16x128xf32> to vector<16x128xbf16>
    %c0_6 = arith.constant 0 : index
    %c0_7 = arith.constant 0 : index
    %9 = vector.load %arg4[%c0_6, %c0_7] : memref<128x128xbf16, #tpu.memory_space<vmem>>, vector<128x128xbf16>
    %cst_8 = arith.constant dense<0.000000e+00> : vector<16x128xf32>
    %10 = tpu.matmul %8, %9, %cst_8 {dimension_numbers = #tpu.dot_dimension_numbers<[1], [0], [0], [1], [0, 0, 1, 1], [], []>} : vector<16x128xbf16>, vector<128x128xbf16>, vector<16x128xf32> -> vector<16x128xf32>
    %c0_9 = arith.constant 0 : index
    %c0_10 = arith.constant 0 : index
    %11 = vector.load %arg5[%c0_9, %c0_10] : memref<1x128xf32, #tpu.memory_space<vmem>>, vector<1x128xf32>
    %12 = vector.broadcast %11 : vector<1x128xf32> to vector<16x128xf32>
    %13 = arith.addf %10, %12 : vector<16x128xf32>
    %c0_11 = arith.constant 0 : index
    %c0_12 = arith.constant 0 : index
    %14 = vector.load %arg6[%c0_11, %c0_12] : memref<16x128xf32, #tpu.memory_space<vmem>>, vector<16x128xf32>
    tpu.vector_store %arg6[%c0_11, %c0_12], %13 {strides = array<i32>} : memref<16x128xf32, #tpu.memory_space<vmem>>, vector<16x128xf32>,
    return
  }
  func.func @transform_0(%arg0: i32) -> (i32, i32) {
    %c0_i32 = arith.constant 0 : i32
    %c0_i32_0 = arith.constant 0 : i32
    return %arg0, %c0_i32 : i32, i32
  }
  func.func @transform_1(%arg0: i32) -> (i32, i32) {
    %c0_i32 = arith.constant 0 : i32
    %c0_i32_0 = arith.constant 0 : i32
    %c0_i32_1 = arith.constant 0 : i32
    return %c0_i32, %c0_i32_0 : i32, i32
  }
  func.func @transform_2(%arg0: i32) -> (i32, i32) {
    %c0_i32 = arith.constant 0 : i32
    %c0_i32_0 = arith.constant 0 : i32
    %c0_i32_1 = arith.constant 0 : i32
    return %c0_i32, %c0_i32_0 : i32, i32
  }
  func.func @transform_3(%arg0: i32) -> (i32, i32) {
    %c0_i32 = arith.constant 0 : i32
    %c0_i32_0 = arith.constant 0 : i32
    %c0_i32_1 = arith.constant 0 : i32
    return %c0_i32, %c0_i32_0 : i32, i32
  }
  func.func @transform_4(%arg0: i32) -> (i32, i32) {
    %c0_i32 = arith.constant 0 : i32
    %c0_i32_0 = arith.constant 0 : i32
    %c0_i32_1 = arith.constant 0 : i32
    return %c0_i32, %c0_i32_0 : i32, i32
  }
  func.func @transform_5(%arg0: i32) -> (i32, i32) {
    %c0_i32 = arith.constant 0 : i32
    %c0_i32_0 = arith.constant 0 : i32
    return %arg0, %c0_i32 : i32, i32
  }
}

</mosaic_0001>

<bundles_post_ra>
// kernel: prediction_head.1
= control target key start
LH: loop header
LB: loop body
LE: loop exit
PB: predicated region body
PF: predicated region fallthrough
CT: control target
= control target key end

     0   :  { %10 = vsyncpa [#allocation3], 0  ;;  %s644_s0 = inlined_call_operand.hbm [shape: bf16[16,32], index: 0, kind: input, shape index: {}]   ;;  %s645_s1 = inlined_call_operand.hbm [shape: bf16[32,128], index: 1, kind: input, shape index: {}]   ;;  %s646_s2 = inlined_call_operand.hbm [shape: f32[1,128], index: 2, kind: input, shape index: {}]   ;;  %s647_s3 = inlined_call_operand.hbm [shape: bf16[128,128], index: 3, kind: input, shape index: {}]   ;;  %s648_s4 = inlined_call_operand.hbm [shape: f32[1,128], index: 4, kind: input, shape index: {}]   ;;  %s649_s5 = inlined_call_operand.hbm [shape: f32[16,128], index: 5, kind: output, shape index: {}]  }
   0x1   :  { %11 = vsyncpa [#allocation6], 0 }
   0x2   :  { %12 = vsyncpa [#allocation9], 0 }
   0x3   :  { %13 = vsyncpa [#allocation4], 0  ;;  %s514_s18 = smov [#allocation5]   ;;  %s515_s20 = smov [#allocation8]  }
   0x4   :  { %s31_s19 = sshll.u32 %s514_s18, 4  ;;  %s53_s21 = sshll.u32 %s515_s20, 4  ;;  %s32_s19 = int_to_ptr.vmem [resolvable:$true] %s31_s19  ;;  %s556_s21 = int_to_ptr.vmem [resolvable:$true] %s53_s21 }
   0x5   :  { %s374_s24 = scalar_lea.hbm %s645_s1, 256 }
   0x6   :  { %p375_p0 = scmp.ne.s32.totalorder %s645_s1, %s374_s24  ;;  %p378_p1 = scmp.lt.u32.totalorder %s374_s24, %s645_s1 }
   0x8   :  { %p380_p2 = pnand %p378_p1, %p375_p0 }
   0xa   :  { %383 = shalt.err (!%p380_p2)
}
   0xb   :  { %s384_s29 = scalar_lea.vmem %s32_s19, 256  ;;  %p389_p4 = scmp.lt.s32.totalorder %s32_s19, %s32_s19 }
   0xc   :  { %p385_p3 = scmp.ne.s32.totalorder %s32_s19, %s384_s29  ;;  %p390_p5 = scmp.lt.s32.totalorder %s384_s29, %s384_s29 }
   0xe   :  { %p391_p6 = por %p390_p5, %p389_p4 }
  0x10   :  { %p392_p7 = pnand %p391_p6, %p385_p3 }
  0x12   :  { %395 = shalt.err (!%p392_p7)
}
  0x13   :  { %s516_s30 = smov 64   ;;  %s517_s6 = smov 4  }
  0x14   :  { %37 = dma.hbm_to_vmem [thread:$0]  %s645_s1, 256, %s32_s19, [#allocation6], %s516_s30, %s516_s30, %s517_s6  }
  0x15   :  { %s396_s11 = scalar_lea.hbm %s647_s3, 1024 }
  0x16   :  { %p397_p8 = scmp.ne.s32.totalorder %s647_s3, %s396_s11  ;;  %p400_p9 = scmp.lt.u32.totalorder %s396_s11, %s647_s3 }
  0x18   :  { %p402_p10 = pnand %p400_p9, %p397_p8 }
  0x1a   :  { %405 = shalt.err (!%p402_p10)
}
  0x1b   :  { %s406_s16 = scalar_lea.vmem %s556_s21, 1024  ;;  %p411_p12 = scmp.lt.s32.totalorder %s556_s21, %s556_s21 }
  0x1c   :  { %p407_p11 = scmp.ne.s32.totalorder %s556_s21, %s406_s16  ;;  %p412_p13 = scmp.lt.s32.totalorder %s406_s16, %s406_s16 }
  0x1e   :  { %p413_p0 = por %p412_p13, %p411_p12 }
  0x20   :  { %p414_p1 = pnand %p413_p0, %p407_p11 }
  0x22   :  { %417 = shalt.err (!%p414_p1)
}
  0x23   :  { %59 = dma.hbm_to_vmem [thread:$0]  %s647_s3, 1024, %s556_s21, [#allocation9], %s516_s30, %s516_s30, %s517_s6  }
  0x24   :  { %s518_s18 = smov [#allocation2]   ;;  %s519_s20 = smov [#allocation7]  }
  0x25   :  { %s19_s19 = sshll.u32 %s518_s18, 4  ;;  %s44_s22 = sshll.u32 %s519_s20, 4  ;;  %s20_s19 = int_to_ptr.vmem [resolvable:$true] %s19_s19  ;;  %s45_s22 = int_to_ptr.vmem [resolvable:$true] %s44_s22 }
  0x26   :  { %s418_s25 = scalar_lea.hbm %s644_s0, 128 }
  0x27   :  { %p419_p2 = scmp.ne.s32.totalorder %s644_s0, %s418_s25  ;;  %p422_p3 = scmp.lt.u32.totalorder %s418_s25, %s644_s0 }
  0x29   :  { %p424_p4 = pnand %p422_p3, %p419_p2 }
  0x2b   :  { %427 = shalt.err (!%p424_p4)
}
  0x2c   :  { %s428_s3 = scalar_lea.vmem %s20_s19, 128  ;;  %p433_p6 = scmp.lt.s32.totalorder %s20_s19, %s20_s19 }
  0x2d   :  { %p429_p5 = scmp.ne.s32.totalorder %s20_s19, %s428_s3  ;;  %p434_p7 = scmp.lt.s32.totalorder %s428_s3, %s428_s3 }
  0x2f   :  { %p435_p8 = por %p434_p7, %p433_p6 }
  0x31   :  { %p436_p9 = pnand %p435_p8, %p429_p5 }
  0x33   :  { %439 = shalt.err (!%p436_p9)
}
  0x34   :  { %25 = dma.hbm_to_vmem [thread:$0]  %s644_s0, 128, %s20_s19, [#allocation3], %s516_s30, %s516_s30, %s517_s6  }
  0x35   :  { %s440_s10 = scalar_lea.hbm %s646_s2, 16 }
  0x36   :  { %p441_p10 = scmp.ne.s32.totalorder %s646_s2, %s440_s10  ;;  %p444_p11 = scmp.lt.u32.totalorder %s440_s10, %s646_s2 }
  0x38   :  { %p446_p12 = pnand %p444_p11, %p441_p10 }
  0x3a   :  { %449 = shalt.err (!%p446_p12)
}
  0x3b   :  { %s450_s15 = scalar_lea.vmem %s45_s22, 16  ;;  %s454_s16 = scalar_lea.vmem %s45_s22, 32 }
  0x3c   :  { %p451_p13 = scmp.ne.s32.totalorder %s45_s22, %s450_s15  ;;  %p455_p0 = scmp.lt.s32.totalorder %s45_s22, %s45_s22 }
  0x3d   :  { %p456_p1 = scmp.lt.s32.totalorder %s454_s16, %s450_s15 }
  0x3f   :  { %p457_p2 = por %p456_p1, %p455_p0 }
  0x41   :  { %p458_p3 = pnand %p457_p2, %p451_p13 }
  0x43   :  { %461 = shalt.err (!%p458_p3)
}
  0x44   :  { %47 = dma.hbm_to_vmem [thread:$0]  %s646_s2, 16, %s45_s22, [#allocation6]  }
  0x45   :  { %s520_s6 = smov [#allocation10]   ;;  %s462_s19 = scalar_lea.hbm %s648_s4, 16 }
  0x46   :  { %s66_s1 = sshll.u32 %s520_s6, 4  ;;  %p463_p4 = scmp.ne.s32.totalorder %s648_s4, %s462_s19  ;;  %s67_s1 = int_to_ptr.vmem [resolvable:$true] %s66_s1 }
  0x47   :  { %p466_p5 = scmp.lt.u32.totalorder %s462_s19, %s648_s4 }
  0x49   :  { %p468_p6 = pnand %p466_p5, %p463_p4 }
  0x4b   :  { %471 = shalt.err (!%p468_p6)
}
  0x4c   :  { %s472_s26 = scalar_lea.vmem %s67_s1, 16  ;;  %s476_s2 = scalar_lea.vmem %s67_s1, 32 }
  0x4d   :  { %p473_p7 = scmp.ne.s32.totalorder %s67_s1, %s472_s26  ;;  %p477_p8 = scmp.lt.s32.totalorder %s67_s1, %s67_s1 }
  0x4e   :  { %p478_p9 = scmp.lt.s32.totalorder %s476_s2, %s472_s26 }
  0x50   :  { %p479_p10 = por %p478_p9, %p477_p8 }
  0x52   :  { %p480_p11 = pnand %p479_p10, %p473_p7 }
  0x54   :  { %483 = shalt.err (!%p480_p11)
}
  0x55   :  { %69 = dma.hbm_to_vmem [thread:$0]  %s648_s4, 16, %s67_s1, [#allocation9]  }
  0x56   :  { %506 = dma.done.wait [#allocation3], 128  }
  0x57   :  { %507 = vsyncadd [#allocation3], 4294967168 }
  0x58   :  { %508 = dma.done.wait [#allocation6], 272  }
  0x59   :  { %509 = vsyncadd [#allocation6], 4294967024 }
  0x5a   :  { %510 = dma.done.wait [#allocation9], 1040  }
  0x5b   :  { %511 = vsyncadd [#allocation9], 4294966256  ;;  %v521_v0 = vmov 0.0   ;;  %vm522_vm0 = vmmov 0   ;;  %v363_v1 = vld [vmem:[#allocation5] sm:$0xff]   ;;  %v364_v2 = vld [vmem:[#allocation5 + $0x8] sm:$0xff]  }
  0x5c   :  { %323 = vmatprep.subr.bf16.mxu0 %v521_v0  ;;  %327 = vmatprep.mubr.msk.bf16.mxu0 %vm522_vm0, %v521_v0  ;;  %v366_v3 = vld [vmem:[#allocation8] sm:$0xff]   ;;  %v367_v5 = vld [vmem:[#allocation8 + $0x8] sm:$0xff]   ;;  %vm116_vm1 = vcmask 261120   ;;  %v368_v6 = vld [vmem:[#allocation8 + $0x10] sm:$0xff]   ;;  %s523_s4 = smov [#allocation11]  }
  0x5d   :  { %331 = vmatprep.subr.bf16.mxu1 %v521_v0  ;;  %347 = vmatprep.mubr.msk.bf16.mxu1 %vm522_vm0, %v521_v0  ;;  %v365_v4 = vld [vmem:[#allocation2] sm:$0xff]   ;;  %v369_v7 = vld [vmem:[#allocation8 + $0x18] sm:$0xff]   ;;  %v372_v10 = vld [vmem:[#allocation8 + $0x30] sm:$0xff]   ;;  %s283_s28 = sshll.u32 %s523_s4, 4  ;;  %s284_s28 = int_to_ptr.vmem [resolvable:$true] %s283_s28 }
  0x5e   :  { %324 = vmatpush3.bf16.msra.mxu0 %v363_v1  ;;  %332 = vmatpush3.bf16.msra.mxu1 %v366_v3  ;;  %v370_v8 = vld [vmem:[#allocation8 + $0x20] sm:$0xff]   ;;  %v371_v9 = vld [vmem:[#allocation8 + $0x28] sm:$0xff]   ;;  %v373_v11 = vld [vmem:[#allocation8 + $0x38] sm:$0xff]   ;;  %s484_s29 = scalar_lea.vmem %s284_s28, 256  ;;  %p489_p13 = scmp.lt.s32.totalorder %s284_s28, %s284_s28 }
  0x5f   :  { %325 = vmatprep.subr.bf16.mxu0 %v521_v0  ;;  %333 = vmatprep.subr.bf16.mxu1 %v521_v0  ;;  %v297_v12 = vld [vmem:[#allocation7] ss:$0 sm:$0xff]  ;;  %v302_v22 = vld [vmem:[#allocation10] ss:$0 sm:$0xff]  ;;  %p485_p12 = scmp.ne.s32.totalorder %s284_s28, %s484_s29  ;;  %p490_p0 = scmp.lt.s32.totalorder %s484_s29, %s484_s29 }
  0x61   :  { %p491_p1 = por %p490_p0, %p489_p13 }
  0x62   :  { %326 = vmatpush3.bf16.msra.mxu0 %v364_v2  ;;  %334 = vmatpush3.bf16.msra.mxu1 %v367_v5 }
  0x63   :  { %335 = vmatprep.subr.bf16.mxu1 %v521_v0  ;;  %p492_p2 = pnand %p491_p1, %p485_p12 }
  0x65   :  { %328 = vmatmul.mubr.msk.bf16.vlgmr.msra.gmra.mrb[0].mxu0 %vm116_vm1, %v365_v4 }
  0x66   :  { %336 = vmatpush3.bf16.msra.mxu1 %v368_v6 }
  0x67   :  { %337 = vmatprep.subr.bf16.mxu1 %v521_v0 }
  0x6a   :  { %338 = vmatpush3.bf16.msra.mxu1 %v369_v7 }
  0x6b   :  { %339 = vmatprep.subr.bf16.mxu1 %v521_v0 }
  0x6e   :  { %340 = vmatpush3.bf16.msra.mxu1 %v370_v8 }
  0x6f   :  { %341 = vmatprep.subr.bf16.mxu1 %v521_v0 }
  0x72   :  { %342 = vmatpush3.bf16.msra.mxu1 %v371_v9 }
  0x73   :  { %343 = vmatprep.subr.bf16.mxu1 %v521_v0 }
  0x76   :  { %344 = vmatpush3.bf16.msra.mxu1 %v372_v10 }
  0x77   :  { %345 = vmatprep.subr.bf16.mxu1 %v521_v0 }
  0x7a   :  { %346 = vmatpush3.bf16.msra.mxu1 %v373_v11 }
 0x138   :  { %v154_v13 = vpop.f32.mrb[0].mxu0 }
 0x139   :  { %v155_v14 = vadd.f32 %v297_v12, %v154_v13  ;;  %v329_v15 = vpop.f32.mrb[1].mxu0 }
 0x13a   :  { %v157_v16 = vpop.f32.mrb[2].mxu0 }
 0x13b   :  { %v158_v17 = vadd.f32 %v297_v12, %v157_v16  ;;  %v330_v18 = vpop.f32.mrb[3].mxu0  ;;  %v161_v19 = vmax.f32 %v155_v14, 0.0 }
 0x13d   :  { %v162_v20 = vmax.f32 %v158_v17, 0.0 }
 0x13f   :  { %v163_v21 = vpack.c.bf16 %v162_v20, %v161_v19 }
 0x141   :  { %348 = vmatmul.mubr.bf16.vlgmr.msra.gmra.mrb[0].mxu1 %v163_v21 }
 0x214   :  { %v269_v23 = vpop.f32.mrb[0].mxu1 }
 0x215   :  { %v270_v24 = vadd.f32 %v302_v22, %v269_v23  ;;  %v349_v25 = vpop.f32.mrb[1].mxu1 }
 0x216   :  { %v272_v26 = vpop.f32.mrb[2].mxu1 }
 0x217   :  { %276 = vst [vmem:[#allocation11] sm:$0xff] %v270_v24  ;;  %v273_v27 = vadd.f32 %v302_v22, %v272_v26  ;;  %v350_v28 = vpop.f32.mrb[3].mxu1 }
 0x219   :  { %277 = vst [vmem:[#allocation11 + $0x8] sm:$0xff] %v273_v27 }
 0x21a   :  { %495 = shalt.err (!%p492_p2)
}
 0x21b   :  { %s496_s7 = scalar_lea.hbm %s649_s5, 256 }
 0x21c   :  { %p497_p3 = scmp.ne.s32.totalorder %s649_s5, %s496_s7  ;;  %p500_p4 = scmp.lt.u32.totalorder %s496_s7, %s649_s5 }
 0x21e   :  { %p502_p5 = pnand %p500_p4, %p497_p3 }
 0x220   :  { %505 = shalt.err (!%p502_p5)
}
 0x221   :  { %s524_s12 = smov 128   ;;  %s525_s13 = smov 8  }
 0x222   :  { %289 = dma.vmem_to_hbm [thread:$0]  %s284_s28, 256, %s649_s5, [#allocation4], %s524_s12, %s524_s12, %s525_s13  }
 0x223   :  { %512 = dma.done.wait [#allocation4], 256  }
 0x224   :  { %513 = vsyncadd [#allocation4], 4294967040 }
 0x225   :  { %293 = vsyncpa [#allocation3], 1 }
 0x226   :  { %294 = vsyncpa [#allocation6], 1 }
 0x227   :  { %295 = vsyncpa [#allocation9], 1 }
 0x228   :  { %296 = vsyncpa [#allocation4], 1 }

</bundles_post_ra>
